<compile_context>
chip_gen: v7x
topology: tpu7x:2x2x1
jax: 0.10.0
libtpu: 0.0.40
codegen_flags: <defaults>
</compile_context>

<pallas_src>
import functools

import jax
import jax.numpy as jnp
from jax.experimental import pallas as pl
from jax.experimental.pallas import tpu as pltpu

LANE = 128
SUBLANE = 8
BLOCK_ROWS_MAX = 2048  # (2048, 128) f32 = 1 MiB per input block


def _int_pow(base, gamma):
    """(base ** gamma) with a VPU multiply chain for small integer gamma."""
    g = float(gamma)
    gi = int(g)
    if g == gi and 0 <= gi <= 8:
        if gi == 0:
            return jnp.ones_like(base)
        w = base
        for _ in range(gi - 1):
            w = w * base
        return w
    return base ** g  # TODO(synk): non-integer gamma falls back to exp/log pow


def _focal_elem(x, t, alpha, gamma):
    """Element-wise focal loss, numerically stable BCE-with-logits."""
    bce = jnp.maximum(x, 0.0) - x * t + jnp.log1p(jnp.exp(-jnp.abs(x)))
    pt = jnp.exp(-bce)
    w = _int_pow(1.0 - pt, gamma)
    f = w * bce
    if float(alpha) != 1.0:
        f = f * jnp.float32(alpha)
    return f


def _focal_reduce_kernel(x_ref, t_ref, out_ref, acc_ref,
                         *, alpha, gamma, n, block_rows, apply_mask,
                         tiles_inner):
    """Accumulate focal loss over inner grid axis; per-partition partial sum."""
    i = pl.program_id(1)

    x = x_ref[...].astype(jnp.float32)
    t = t_ref[...].astype(jnp.float32)
    f = _focal_elem(x, t, alpha, gamma)

    if apply_mask:
        # Zero out zero-padded tail elements (index >= n), computed in-kernel
        # (no mask array streamed from HBM).
        p = pl.program_id(0)
        row_base = (p * tiles_inner + i) * block_rows
        ridx = jax.lax.broadcasted_iota(jnp.int32, f.shape, 0)
        cidx = jax.lax.broadcasted_iota(jnp.int32, f.shape, 1)
        gidx = (row_base + ridx) * LANE + cidx
        f = jnp.where(gidx < n, f, 0.0)

    if tiles_inner == 1:
        # Single inner step: skip the accumulator round-trip entirely.
        out_ref[0, 0] = jnp.sum(f)
        return

    @pl.when(i == 0)
    def _():
        acc_ref[...] = jnp.zeros_like(acc_ref)

    acc_ref[...] += f  # VPU element-wise accumulate; no per-step XLU reduce

    @pl.when(i == tiles_inner - 1)
    def _():
        out_ref[0, 0] = jnp.sum(acc_ref[...])


def _focal_none_kernel(x_ref, t_ref, o_ref, *, alpha, gamma):
    x = x_ref[...].astype(jnp.float32)
    t = t_ref[...].astype(jnp.float32)
    o_ref[...] = _focal_elem(x, t, alpha, gamma).astype(o_ref.dtype)


def _to_slab(a, total_rows):
    """Flatten to (total_rows, LANE), zero-padded, keeping float dtypes native."""
    a = jnp.ravel(a)
    if not jnp.issubdtype(a.dtype, jnp.floating):
        a = a.astype(jnp.float32)
    pad = total_rows * LANE - a.shape[0]
    if pad:
        a = jnp.pad(a, (0, pad))
    return a.reshape(total_rows, LANE)


def focal_loss(inputs, targets, alpha=1.0, gamma=2.0, reduction="mean"):
    """Pallas TPU implementation of FocalLoss.forward."""
    orig_shape = inputs.shape
    n = int(inputs.size)
    rows = -(-n // LANE)
    rows8 = -(-rows // SUBLANE) * SUBLANE
    block_rows = min(BLOCK_ROWS_MAX, rows8)
    tiles = -(-rows8 // block_rows)

    if reduction == "none":
        out_dtype = (inputs.dtype if jnp.issubdtype(inputs.dtype, jnp.floating)
                     else jnp.float32)
        rows_pad = tiles * block_rows
        x = _to_slab(inputs, rows_pad)
        t = _to_slab(targets, rows_pad)
        elems = rows_pad * LANE
        spec = pl.BlockSpec((block_rows, LANE), lambda i: (i, 0))
        ce = pl.CostEstimate(
            flops=12 * elems,
            transcendentals=3 * elems,
            bytes_accessed=int(x.size) * x.dtype.itemsize
            + int(t.size) * t.dtype.itemsize
            + elems * jnp.dtype(out_dtype).itemsize)
        out = pl.pallas_call(
            functools.partial(_focal_none_kernel,
                              alpha=float(alpha), gamma=float(gamma)),
            out_shape=jax.ShapeDtypeStruct((rows_pad, LANE), out_dtype),
            grid_spec=pltpu.PrefetchScalarGridSpec(
                num_scalar_prefetch=0,
                grid=(tiles,),
                in_specs=[spec, spec],
                out_specs=spec,
            ),
            compiler_params=pltpu.CompilerParams(
                dimension_semantics=("parallel",)),
            cost_estimate=ce,
        )(x, t)
        return out.reshape(-1)[:n].reshape(orig_shape)

    # 'mean' / 'sum': partial sums per partition, combined in the wrapper.
    num_parts = 2 if tiles >= 2 else 1          # v7x: 2 TCs; harmless on v5e/v6e
    tiles_inner = -(-tiles // num_parts)
    rows_pad = num_parts * tiles_inner * block_rows
    x = _to_slab(inputs, rows_pad)
    t = _to_slab(targets, rows_pad)
    apply_mask = (rows_pad * LANE != n)
    elems = rows_pad * LANE

    in_spec = pl.BlockSpec((block_rows, LANE),
                           lambda p, i: (p * tiles_inner + i, 0))
    out_spec = pl.BlockSpec((1, 1), lambda p, i: (p, 0),
                            memory_space=pltpu.SMEM)
    ce = pl.CostEstimate(
        flops=12 * elems,
        transcendentals=3 * elems,
        bytes_accessed=int(x.size) * x.dtype.itemsize
        + int(t.size) * t.dtype.itemsize + num_parts * 4)

    partials = pl.pallas_call(
        functools.partial(_focal_reduce_kernel,
                          alpha=float(alpha), gamma=float(gamma),
                          n=n, block_rows=block_rows, apply_mask=apply_mask,
                          tiles_inner=tiles_inner),
        out_shape=jax.ShapeDtypeStruct((num_parts, 1), jnp.float32),
        grid_spec=pltpu.PrefetchScalarGridSpec(
            num_scalar_prefetch=0,
            grid=(num_parts, tiles_inner),
            in_specs=[in_spec, in_spec],
            out_specs=out_spec,
            scratch_shapes=[pltpu.VMEM((block_rows, LANE), jnp.float32)],
        ),
        compiler_params=pltpu.CompilerParams(
            dimension_semantics=("parallel", "arbitrary")),
        cost_estimate=ce,
    )(x, t)

    total = jnp.sum(partials)
    if reduction == "mean":
        return total / jnp.float32(n)
    return total


def _focal_loss_ref(inputs, targets, alpha=1.0, gamma=2.0, reduction="mean"):
    x = inputs.astype(jnp.float32)
    t = targets.astype(jnp.float32)
    bce = jnp.maximum(x, 0.0) - x * t + jnp.log1p(jnp.exp(-jnp.abs(x)))
    pt = jnp.exp(-bce)
    f = alpha * (1.0 - pt) ** gamma * bce
    if reduction == "mean":
        return jnp.mean(f)
    if reduction == "sum":
        return jnp.sum(f)
    return f


if __name__ == "__main__":
    key = jax.random.PRNGKey(0)
    k1, k2 = jax.random.split(key)
    # logits (NCHW) and binary targets, shapes consistent with a segmentation head
    x = jax.random.normal(k1, (2, 4, 16, 16), dtype=jnp.float32)
    t = (jax.random.uniform(k2, (2, 4, 16, 16)) > 0.5).astype(jnp.float32)

    out_mean = jax.block_until_ready(focal_loss(x, t, 1.0, 2.0, "mean"))
    ref_mean = _focal_loss_ref(x, t, 1.0, 2.0, "mean")
    assert jnp.allclose(out_mean, ref_mean, rtol=1e-5, atol=1e-6), (out_mean, ref_mean)

    out_sum = jax.block_until_ready(focal_loss(x, t, 1.0, 2.0, "sum"))
    ref_sum = _focal_loss_ref(x, t, 1.0, 2.0, "sum")
    assert jnp.allclose(out_sum, ref_sum, rtol=1e-5, atol=1e-5), (out_sum, ref_sum)

    out_none = jax.block_until_ready(focal_loss(x, t, 1.0, 2.0, "none"))
    ref_none = _focal_loss_ref(x, t, 1.0, 2.0, "none")
    assert jnp.allclose(out_none, ref_none, rtol=1e-5, atol=1e-6)

    # Non-aligned size exercises the in-kernel padding mask path.
    k3, k4 = jax.random.split(k1)
    x2 = jax.random.normal(k3, (3, 5, 7, 11), dtype=jnp.float32)
    t2 = (jax.random.uniform(k4, (3, 5, 7, 11)) > 0.5).astype(jnp.float32)
    out2 = jax.block_until_ready(focal_loss(x2, t2, 0.25, 2.0, "mean"))
    ref2 = _focal_loss_ref(x2, t2, 0.25, 2.0, "mean")
    assert jnp.allclose(out2, ref2, rtol=1e-5, atol=1e-6), (out2, ref2)

    print("KERNEL_OK")
</pallas_src>

<mosaic_0001>
module attributes {stable_mosaic.version = 11 : i64} {
  func.func @_focal_reduce_kernel(%arg0: i32, %arg1: i32, %arg2: memref<16x128xf32, #tpu.memory_space<vmem>>, %arg3: memref<16x128xf32, #tpu.memory_space<vmem>>, %arg4: memref<1x1xf32, #tpu.memory_space<smem>>, %arg5: memref<16x128xf32, #tpu.memory_space<vmem>>) attributes {dimension_semantics = [#tpu.dimension_semantics<parallel>, #tpu.dimension_semantics<arbitrary>], iteration_bounds = array<i64: 1, 1>, scalar_prefetch = 0 : i64, scratch_operands = 1 : i64, tpu.core_type = #tpu.core_type<tc>, window_params = [{transform_indices = @transform_0, window_bounds = array<i64: 16, 128>}, {transform_indices = @transform_1, window_bounds = array<i64: 16, 128>}, {transform_indices = @transform_2, window_bounds = array<i64: 1, 1>}]} {
    %c0 = arith.constant 0 : index
    %c0_0 = arith.constant 0 : index
    %0 = vector.load %arg2[%c0, %c0_0] : memref<16x128xf32, #tpu.memory_space<vmem>>, vector<16x128xf32>
    %c0_1 = arith.constant 0 : index
    %c0_2 = arith.constant 0 : index
    %1 = vector.load %arg3[%c0_1, %c0_2] : memref<16x128xf32, #tpu.memory_space<vmem>>, vector<16x128xf32>
    %cst = arith.constant 0.000000e+00 : f32
    %2 = vector.broadcast %cst : f32 to vector<16x128xf32>
    %3 = arith.maximumf %0, %2 : vector<16x128xf32>
    %4 = arith.mulf %0, %1 : vector<16x128xf32>
    %5 = arith.subf %3, %4 : vector<16x128xf32>
    %6 = math.absf %0 : vector<16x128xf32>
    %cst_3 = arith.constant 0.000000e+00 : f32
    %7 = vector.broadcast %cst_3 : f32 to vector<16x128xf32>
    %8 = arith.subf %7, %6 : vector<16x128xf32>
    %9 = math.exp %8 : vector<16x128xf32>
    %10 = math.log1p %9 : vector<16x128xf32>
    %11 = arith.addf %5, %10 : vector<16x128xf32>
    %cst_4 = arith.constant 0.000000e+00 : f32
    %12 = vector.broadcast %cst_4 : f32 to vector<16x128xf32>
    %13 = arith.subf %12, %11 : vector<16x128xf32>
    %14 = math.exp %13 : vector<16x128xf32>
    %cst_5 = arith.constant 1.000000e+00 : f32
    %15 = vector.broadcast %cst_5 : f32 to vector<16x128xf32>
    %16 = arith.subf %15, %14 : vector<16x128xf32>
    %17 = arith.mulf %16, %16 : vector<16x128xf32>
    %18 = arith.mulf %17, %11 : vector<16x128xf32>
    %19 = vector.shape_cast %18 : vector<16x128xf32> to vector<1x16x128xf32>
    %cst_6 = arith.constant dense<0.000000e+00> : vector<1xf32>
    %20 = vector.multi_reduction <add>, %19, %cst_6 [1, 2] : vector<1x16x128xf32> to vector<1xf32>
    %21 = vector.shape_cast %20 : vector<1xf32> to vector<1x1x1xf32>
    %22 = vector.extract %21[0, 0, 0] : f32 from vector<1x1x1xf32>
    %c0_7 = arith.constant 0 : index
    %c0_8 = arith.constant 0 : index
    %23 = memref.load %arg4[%c0_7, %c0_8] : memref<1x1xf32, #tpu.memory_space<smem>>
    memref.store %22, %arg4[%c0_7, %c0_8] : memref<1x1xf32, #tpu.memory_space<smem>>
    return
  }
  func.func @transform_0(%arg0: i32, %arg1: i32) -> (i32, i32) {
    %c1_i32 = arith.constant 1 : i32
    %0 = arith.muli %arg0, %c1_i32 : i32
    %1 = arith.addi %0, %arg1 : i32
    %c0_i32 = arith.constant 0 : i32
    %c0_i32_0 = arith.constant 0 : i32
    return %1, %c0_i32 : i32, i32
  }
  func.func @transform_1(%arg0: i32, %arg1: i32) -> (i32, i32) {
    %c1_i32 = arith.constant 1 : i32
    %0 = arith.muli %arg0, %c1_i32 : i32
    %1 = arith.addi %0, %arg1 : i32
    %c0_i32 = arith.constant 0 : i32
    %c0_i32_0 = arith.constant 0 : i32
    return %1, %c0_i32 : i32, i32
  }
  func.func @transform_2(%arg0: i32, %arg1: i32) -> (i32, i32) {
    %c0_i32 = arith.constant 0 : i32
    %c0_i32_0 = arith.constant 0 : i32
    return %arg0, %c0_i32 : i32, i32
  }
}

</mosaic_0001>

<bundles_post_ra>
// kernel: tpu_custom_call.1
= control target key start
LH: loop header
LB: loop body
LE: loop exit
PB: predicated region body
PF: predicated region fallthrough
CT: control target
= control target key end

     0   :  { %7 = vsyncpa [#allocation4], 0  ;;  %s264_s0 = inlined_call_operand.hbm [shape: f32[16,128], index: 0, kind: input, shape index: {}]   ;;  %s265_s1 = inlined_call_operand.hbm [shape: f32[16,128], index: 1, kind: input, shape index: {}]   ;;  %s266_s2 = inlined_call_operand.hbm [shape: f32[1,1], index: 2, kind: output, shape index: {}]  }
   0x1   :  { %8 = vsyncpa [#allocation7], 0 }
   0x2   :  { %9 = vsyncpa [#allocation5], 0  ;;  %s208_s9 = smov [#allocation3]   ;;  %s148_s13 = scalar_lea.hbm %s264_s0, 256 }
   0x3   :  { %s19_s10 = sshll.u32 %s208_s9, 4  ;;  %p149_p0 = scmp.ne.s32.totalorder %s264_s0, %s148_s13  ;;  %s20_s10 = int_to_ptr.vmem [resolvable:$true] %s19_s10 }
   0x4   :  { %p152_p1 = scmp.lt.u32.totalorder %s148_s13, %s264_s0 }
   0x6   :  { %p154_p2 = pnand %p152_p1, %p149_p0 }
   0x8   :  { %157 = shalt.err (!%p154_p2)
}
   0x9   :  { %s158_s18 = scalar_lea.vmem %s20_s10, 256  ;;  %p163_p4 = scmp.lt.s32.totalorder %s20_s10, %s20_s10 }
   0xa   :  { %p159_p3 = scmp.ne.s32.totalorder %s20_s10, %s158_s18  ;;  %p164_p5 = scmp.lt.s32.totalorder %s158_s18, %s158_s18 }
   0xc   :  { %p165_p6 = por %p164_p5, %p163_p4 }
   0xe   :  { %p166_p7 = pnand %p165_p6, %p159_p3 }
  0x10   :  { %169 = shalt.err (!%p166_p7)
}
  0x11   :  { %s209_s19 = smov 128   ;;  %s210_s20 = smov 8  }
  0x12   :  { %25 = dma.hbm_to_vmem [thread:$0]  %s264_s0, 256, %s20_s10, [#allocation4], %s209_s19, %s209_s19, %s210_s20  }
  0x13   :  { %s211_s23 = smov [#allocation6]   ;;  %s170_s27 = scalar_lea.hbm %s265_s1, 256 }
  0x14   :  { %s35_s24 = sshll.u32 %s211_s23, 4  ;;  %p171_p8 = scmp.ne.s32.totalorder %s265_s1, %s170_s27  ;;  %s36_s24 = int_to_ptr.vmem [resolvable:$true] %s35_s24 }
  0x15   :  { %p174_p9 = scmp.lt.u32.totalorder %s170_s27, %s265_s1 }
  0x17   :  { %p176_p10 = pnand %p174_p9, %p171_p8 }
  0x19   :  { %179 = shalt.err (!%p176_p10)
}
  0x1a   :  { %s180_s4 = scalar_lea.vmem %s36_s24, 256  ;;  %p185_p12 = scmp.lt.s32.totalorder %s36_s24, %s36_s24 }
  0x1b   :  { %p181_p11 = scmp.ne.s32.totalorder %s36_s24, %s180_s4  ;;  %p186_p13 = scmp.lt.s32.totalorder %s180_s4, %s180_s4 }
  0x1d   :  { %p187_p0 = por %p186_p13, %p185_p12 }
  0x1f   :  { %p188_p1 = pnand %p187_p0, %p181_p11 }
  0x21   :  { %191 = shalt.err (!%p188_p1)
}
  0x22   :  { %41 = dma.hbm_to_vmem [thread:$0]  %s265_s1, 256, %s36_s24, [#allocation7], %s209_s19, %s209_s19, %s210_s20  }
  0x23   :  { %202 = dma.done.wait [#allocation4], 256  }
  0x24   :  { %203 = vsyncadd [#allocation4], 4294967040 }
  0x25   :  { %204 = dma.done.wait [#allocation7], 256  }
  0x26   :  { %205 = vsyncadd [#allocation7], 4294967040  ;;  %v52_v0 = vld [vmem:[#allocation3] sm:$0xff]  ;;  %v53_v1 = vld [vmem:[#allocation3 + $0x8] sm:$0xff]  ;;  %s192_s8 = scalar_lea.hbm %s266_s2, 16 }
  0x27   :  { %v62_v2 = vand.u32 2147483647, %v52_v0  ;;  %v63_v3 = vand.u32 2147483647, %v53_v1  ;;  %v54_v14 = vld [vmem:[#allocation6] sm:$0xff]  ;;  %v55_v15 = vld [vmem:[#allocation6 + $0x8] sm:$0xff]  ;;  %p193_p2 = scmp.ne.s32.totalorder %s266_s2, %s192_s8  ;;  %p196_p3 = scmp.lt.u32.totalorder %s192_s8, %s266_s2 }
  0x28   :  { %v56_v17 = vmax.f32 %v52_v0, 0.0  ;;  %v58_v18 = vmul.f32 %v54_v14, %v52_v0  ;;  %v57_v21 = vmax.f32 %v53_v1, 0.0  ;;  %v59_v22 = vmul.f32 %v55_v15, %v53_v1 }
  0x29   :  { %v64_v4 = vsub.f32 0.0, %v62_v2  ;;  %v65_v5 = vsub.f32 0.0, %v63_v3  ;;  %p198_p4 = pnand %p196_p3, %p193_p2 }
  0x2a   :  { %v60_v26 = vsub.f32 %v56_v17, %v58_v18  ;;  %v61_v29 = vsub.f32 %v57_v21, %v59_v22 }
  0x2b   :  { %v66_v6 = vmul.f32 1.442695, %v64_v4  ;;  %v68_v7 = vmul.f32 1.442695, %v65_v5 }
  0x2d   :  { %136 = vpow2.f32 %v66_v6 }
  0x2e   :  { %138 = vpow2.f32 %v68_v7 }
  0x37   :  { %v137_v8 = vpop.eup %136 }
  0x38   :  { %v139_v9 = vpop.eup %138  ;;  %v70_v10 = vadd.f32 1.0, %v137_v8  ;;  %v73_v12 = vmul.f32 -0.5, %v137_v8  ;;  %v76_v19 = vand.u32 2147483647, %v137_v8 }
  0x39   :  { %v79_v11 = vadd.f32 1.0, %v139_v9  ;;  %v82_v13 = vmul.f32 -0.5, %v139_v9  ;;  %v85_v23 = vand.u32 2147483647, %v139_v9 }
  0x3a   :  { %140 = vlog2.f32 %v70_v10  ;;  %v74_v16 = vadd.f32 1.0, %v73_v12  ;;  %vm77_vm0 = vcmp.lt.f32.partialorder %v76_v19, 0.0004427343 }
  0x3b   :  { %142 = vlog2.f32 %v79_v11  ;;  %v83_v20 = vadd.f32 1.0, %v82_v13  ;;  %vm86_vm1 = vcmp.lt.f32.partialorder %v85_v23, 0.0004427343 }
  0x3c   :  { %v75_v24 = vmul.f32 %v137_v8, %v74_v16 }
  0x3d   :  { %v84_v27 = vmul.f32 %v139_v9, %v83_v20 }
  0x44   :  { %v141_v25 = vpop.eup %140 }
  0x45   :  { %v143_v28 = vpop.eup %142  ;;  %v72_v30 = vmul.f32 0.6931472, %v141_v25 }
  0x46   :  { %v81_v31 = vmul.f32 0.6931472, %v143_v28 }
  0x47   :  { %v78_v32 = vsel %vm77_vm0, %v75_v24, %v72_v30 }
  0x48   :  { %v87_v33 = vsel %vm86_vm1, %v84_v27, %v81_v31  ;;  %v88_v34 = vadd.f32 %v78_v32, %v60_v26 }
  0x49   :  { %v89_v35 = vadd.f32 %v87_v33, %v61_v29 }
  0x4a   :  { %v90_v36 = vsub.f32 0.0, %v88_v34 }
  0x4b   :  { %v91_v37 = vsub.f32 0.0, %v89_v35 }
  0x4c   :  { %v92_v38 = vmul.f32 1.442695, %v90_v36 }
  0x4d   :  { %v94_v39 = vmul.f32 1.442695, %v91_v37 }
  0x4e   :  { %144 = vpow2.f32 %v92_v38 }
  0x4f   :  { %146 = vpow2.f32 %v94_v39 }
  0x58   :  { %v145_v40 = vpop.eup %144 }
  0x59   :  { %v147_v41 = vpop.eup %146  ;;  %v96_v42 = vsub.f32 1.0, %v145_v40 }
  0x5a   :  { %v97_v43 = vsub.f32 1.0, %v147_v41 }
  0x5b   :  { %v98_v44 = vmul.f32 %v96_v42, %v96_v42 }
  0x5c   :  { %v99_v45 = vmul.f32 %v97_v43, %v97_v43 }
  0x5d   :  { %v100_v46 = vmul.f32 %v98_v44, %v88_v34 }
  0x5e   :  { %v101_v47 = vmul.f32 %v99_v45, %v89_v35 }
  0x60   :  { %v102_v48 = vadd.f32 %v101_v47, %v100_v46 }
  0x62   :  { %103 = vadd.xlane.f32.xlu0 %v102_v48 }
  0xef   :  { %v104_v49 = vpop.xlane.xlu0 %103 }
  0xf0   :  { %v105_v50 = vrot.slane %v104_v49, 4 }
  0xf2   :  { %v106_v51 = vadd.f32 %v105_v50, %v104_v49 }
  0xf4   :  { %v107_v52 = vrot.slane %v106_v51, 2 }
  0xf6   :  { %v108_v53 = vadd.f32 %v107_v52, %v106_v51 }
  0xf8   :  { %v109_v54 = vrot.slane %v108_v53, 1 }
  0xfa   :  { %v110_v55 = vadd.f32 %v109_v54, %v108_v53 }
  0xfc   :  { %129 = vpush %v110_v55 }
 0x12d   :  { %s130_s1 = spop %129 }
 0x12e   :  { %113 = sst [smem:[#allocation8]] %s130_s1 }
 0x12f   :  { %201 = shalt.err (!%p198_p4)
}
 0x130   :  { %s212_s13 = smov [#allocation8]  }
 0x131   :  { %121 = dma.smem_to_hbm %s212_s13, 16, %s266_s2, [#allocation5]  }
 0x132   :  { %206 = dma.done.wait [#allocation5], 16  }
 0x133   :  { %207 = vsyncadd [#allocation5], 4294967280 }
 0x134   :  { %125 = sfence }
 0x135   :  { %126 = vsyncpa [#allocation4], 1 }
 0x136   :  { %127 = vsyncpa [#allocation7], 1 }
 0x137   :  { %128 = vsyncpa [#allocation5], 1 }

</bundles_post_ra>
